<compile_context>
chip_gen: v6e
topology: v6e:2x2x1
jax: 0.10.0
libtpu: 0.0.40
codegen_flags: <defaults>
</compile_context>

<pallas_src>
import functools

import jax
import jax.numpy as jnp
from jax import lax
from jax.experimental import pallas as pl
from jax.experimental.pallas import tpu as pltpu

PAIRWISE_EPS = 1e-6  # matches torch F.pairwise_distance default eps


def _round_up(x, m):
    return ((x + m - 1) // m) * m


def _choose_tile_b(b, d, itemsize):
    # Keep 2 inputs x 2 pipeline buffers x tile_b x d x itemsize <= ~8 MiB so the
    # pipelined working set stays well under scoped-VMEM defaults on v5e/v6e/v7x.
    budget = 8 * 1024 * 1024
    max_tile = budget // max(1, 4 * d * itemsize)
    max_tile = max(8, (max_tile // 8) * 8)          # multiple of 8 sublanes
    tile = min(1024, max_tile, _round_up(b, 8))     # don't exceed (padded) batch
    return max(8, tile)


def _contrastive_loss_kernel(o1_ref, o2_ref, lbl_ref, out_ref, *,
                             true_b, tile_b, margin):
    # Load native dtype, cast to f32 in-register (v5e VPU has no bf16 anyway).
    o1 = o1_ref[...].astype(jnp.float32)                 # (tile_b, D)
    o2 = o2_ref[...].astype(jnp.float32)                 # (tile_b, D)
    lbl = lbl_ref[...].astype(jnp.float32)               # (tile_b, 1)

    diff = o1 - o2 + PAIRWISE_EPS                        # VPU
    sq_sum = jnp.sum(diff * diff, axis=1, keepdims=True)  # (tile_b, 1) XLU reduce
    dist = jnp.sqrt(sq_sum)                              # EUP, only for hinge term
    hinge = jnp.maximum(margin - dist, 0.0)              # clamp(margin - d, min=0)
    # Use sq_sum directly for the similar-pair term (== d^2, cheaper & exact).
    per_ex = (1.0 - lbl) * sq_sum + lbl * (hinge * hinge)  # (tile_b, 1)

    if true_b % tile_b != 0:
        # Mask rows beyond the true batch in the (padded) last tile.
        row = (pl.program_id(0) * tile_b
               + lax.broadcasted_iota(jnp.int32, (tile_b, 1), 0))
        per_ex = jnp.where(row < true_b, per_ex, 0.0)

    partial = jnp.sum(per_ex)
    # Lane-dense, unmasked store of the per-block partial sum.
    out_ref[...] = jnp.full(out_ref.shape, partial, dtype=out_ref.dtype)


def contrastive_loss(output1, output2, label, margin=2.0, tile_b=None):
    """Mean contrastive loss. output1/output2: (B, D); label: (B,)."""
    b, d = output1.shape
    lbl = label.reshape(b, 1)

    itemsize = jnp.dtype(output1.dtype).itemsize
    if tile_b is None:
        tile_b = _choose_tile_b(b, d, itemsize)
    n_blocks = pl.cdiv(b, tile_b)

    kernel = functools.partial(
        _contrastive_loss_kernel,
        true_b=b, tile_b=tile_b, margin=float(margin),
    )

    partials = pl.pallas_call(
        kernel,
        out_shape=jax.ShapeDtypeStruct((n_blocks, 8, 128), jnp.float32),
        grid=(n_blocks,),
        in_specs=[
            pl.BlockSpec((tile_b, d), lambda i: (i, 0)),
            pl.BlockSpec((tile_b, d), lambda i: (i, 0)),
            pl.BlockSpec((tile_b, 1), lambda i: (i, 0)),
        ],
        out_specs=pl.BlockSpec((1, 8, 128), lambda i: (i, 0, 0)),
        compiler_params=pltpu.CompilerParams(
            dimension_semantics=("parallel",),      # shards across TCs on v7x
            vmem_limit_bytes=32 * 1024 * 1024,      # safe on v5e/v6e/v7x
        ),
    )(output1, output2, lbl)

    # Tiny final reduction in the wrapper; divide by the TRUE batch size.
    return jnp.sum(partials[:, 0, 0]) / b


def contrastive_loss_ref(output1, output2, label, margin=2.0):
    # Pure-JAX reference mirroring the PyTorch forward.
    diff = output1.astype(jnp.float32) - output2.astype(jnp.float32) + PAIRWISE_EPS
    dist = jnp.sqrt(jnp.sum(diff * diff, axis=1))
    loss = ((1.0 - label) * dist**2
            + label * jnp.maximum(margin - dist, 0.0) ** 2)
    return jnp.mean(loss)


if __name__ == "__main__":
    key = jax.random.PRNGKey(0)
    k1, k2, k3, k4, k5, k6 = jax.random.split(key, 6)

    # Small shapes consistent with the module: embedding batch + feature dim.
    B, D = 8, 32
    output1 = jax.random.normal(k1, (B, D), dtype=jnp.float32)
    output2 = jax.random.normal(k2, (B, D), dtype=jnp.float32)
    label = jax.random.bernoulli(k3, p=0.5, shape=(B,)).astype(jnp.float32)

    loss = jax.block_until_ready(contrastive_loss(output1, output2, label))
    ref = contrastive_loss_ref(output1, output2, label)
    assert jnp.allclose(loss, ref, rtol=1e-5, atol=1e-5), (loss, ref)

    # Second check: exercises multi-block grid + padded-row masking (B % tile != 0).
    B2, D2 = 20, 128
    a1 = jax.random.normal(k4, (B2, D2), dtype=jnp.float32)
    a2 = jax.random.normal(k5, (B2, D2), dtype=jnp.float32)
    lb2 = jax.random.bernoulli(k6, p=0.5, shape=(B2,)).astype(jnp.float32)

    loss2 = jax.block_until_ready(contrastive_loss(a1, a2, lb2, tile_b=8))
    ref2 = contrastive_loss_ref(a1, a2, lb2)
    assert jnp.allclose(loss2, ref2, rtol=1e-5, atol=1e-5), (loss2, ref2)

    print("KERNEL_OK")
</pallas_src>

<mosaic_0001>
module attributes {stable_mosaic.version = 11 : i64} {
  func.func @_contrastive_loss_kernel(%arg0: i32, %arg1: memref<8x32xf32, #tpu.memory_space<vmem>>, %arg2: memref<8x32xf32, #tpu.memory_space<vmem>>, %arg3: memref<8x1xf32, #tpu.memory_space<vmem>>, %arg4: memref<1x8x128xf32, #tpu.memory_space<vmem>>) attributes {dimension_semantics = [#tpu.dimension_semantics<parallel>], iteration_bounds = array<i64: 1>, scalar_prefetch = 0 : i64, scratch_operands = 0 : i64, tpu.core_type = #tpu.core_type<tc>, window_params = [{transform_indices = @transform_0, window_bounds = array<i64: 8, 32>}, {transform_indices = @transform_1, window_bounds = array<i64: 8, 32>}, {transform_indices = @transform_2, window_bounds = array<i64: 8, 1>}, {transform_indices = @transform_3, window_bounds = array<i64: 1, 8, 128>}]} {
    %c0 = arith.constant 0 : index
    %c0_0 = arith.constant 0 : index
    %0 = vector.load %arg1[%c0, %c0_0] : memref<8x32xf32, #tpu.memory_space<vmem>>, vector<8x32xf32>
    %c0_1 = arith.constant 0 : index
    %c0_2 = arith.constant 0 : index
    %1 = vector.load %arg2[%c0_1, %c0_2] : memref<8x32xf32, #tpu.memory_space<vmem>>, vector<8x32xf32>
    %c0_3 = arith.constant 0 : index
    %c0_4 = arith.constant 0 : index
    %2 = vector.load %arg3[%c0_3, %c0_4] : memref<8x1xf32, #tpu.memory_space<vmem>>, vector<8x1xf32>
    %3 = arith.subf %0, %1 : vector<8x32xf32>
    %cst = arith.constant 9.99999997E-7 : f32
    %4 = vector.broadcast %cst : f32 to vector<8x32xf32>
    %5 = arith.addf %3, %4 : vector<8x32xf32>
    %6 = arith.mulf %5, %5 : vector<8x32xf32>
    %cst_5 = arith.constant dense<0.000000e+00> : vector<8xf32>
    %7 = vector.multi_reduction <add>, %6, %cst_5 [1] : vector<8x32xf32> to vector<8xf32>
    %8 = vector.shape_cast %7 : vector<8xf32> to vector<8x1xf32>
    %9 = math.sqrt %8 : vector<8x1xf32>
    %cst_6 = arith.constant 2.000000e+00 : f32
    %10 = vector.broadcast %cst_6 : f32 to vector<8x1xf32>
    %11 = arith.subf %10, %9 : vector<8x1xf32>
    %cst_7 = arith.constant 0.000000e+00 : f32
    %12 = vector.broadcast %cst_7 : f32 to vector<8x1xf32>
    %13 = arith.maximumf %11, %12 : vector<8x1xf32>
    %cst_8 = arith.constant 1.000000e+00 : f32
    %14 = vector.broadcast %cst_8 : f32 to vector<8x1xf32>
    %15 = arith.subf %14, %2 : vector<8x1xf32>
    %16 = arith.mulf %15, %8 : vector<8x1xf32>
    %17 = arith.mulf %13, %13 : vector<8x1xf32>
    %18 = arith.mulf %2, %17 : vector<8x1xf32>
    %19 = arith.addf %16, %18 : vector<8x1xf32>
    %20 = vector.shape_cast %19 : vector<8x1xf32> to vector<1x8x1xf32>
    %cst_9 = arith.constant dense<0.000000e+00> : vector<1xf32>
    %21 = vector.multi_reduction <add>, %20, %cst_9 [1, 2] : vector<1x8x1xf32> to vector<1xf32>
    %22 = vector.shape_cast %21 : vector<1xf32> to vector<1x1x1xf32>
    %23 = vector.extract %22[0, 0, 0] : f32 from vector<1x1x1xf32>
    %24 = vector.broadcast %23 : f32 to vector<1x8x128xf32>
    %c0_10 = arith.constant 0 : index
    %c0_11 = arith.constant 0 : index
    %c0_12 = arith.constant 0 : index
    %25 = vector.load %arg4[%c0_10, %c0_11, %c0_12] : memref<1x8x128xf32, #tpu.memory_space<vmem>>, vector<1x8x128xf32>
    tpu.vector_store %arg4[%c0_10, %c0_11, %c0_12], %24 {strides = array<i32>} : memref<1x8x128xf32, #tpu.memory_space<vmem>>, vector<1x8x128xf32>,
    return
  }
  func.func @transform_0(%arg0: i32) -> (i32, i32) {
    %c0_i32 = arith.constant 0 : i32
    %c0_i32_0 = arith.constant 0 : i32
    return %arg0, %c0_i32 : i32, i32
  }
  func.func @transform_1(%arg0: i32) -> (i32, i32) {
    %c0_i32 = arith.constant 0 : i32
    %c0_i32_0 = arith.constant 0 : i32
    return %arg0, %c0_i32 : i32, i32
  }
  func.func @transform_2(%arg0: i32) -> (i32, i32) {
    %c0_i32 = arith.constant 0 : i32
    %c0_i32_0 = arith.constant 0 : i32
    return %arg0, %c0_i32 : i32, i32
  }
  func.func @transform_3(%arg0: i32) -> (i32, i32, i32) {
    %c0_i32 = arith.constant 0 : i32
    %c0_i32_0 = arith.constant 0 : i32
    %c0_i32_1 = arith.constant 0 : i32
    return %arg0, %c0_i32, %c0_i32_0 : i32, i32, i32
  }
}

</mosaic_0001>

<bundles_post_ra>
// kernel: tpu_custom_call.1
= control target key start
LH: loop header
LB: loop body
LE: loop exit
PB: predicated region body
PF: predicated region fallthrough
CT: control target
= control target key end

     0   :  { %8 = vsyncpa [#allocation3], 0  ;;  %s163_s0 = inlined_call_operand.vmem [shape: f32[8,32], index: 0, kind: input, shape index: {}]   ;;  %s164_s1 = inlined_call_operand.hbm [shape: f32[8,32], index: 1, kind: input, shape index: {}]   ;;  %s165_s2 = inlined_call_operand.vmem [shape: f32[8,1], index: 2, kind: input, shape index: {}]   ;;  %s166_s3 = inlined_call_operand.hbm [shape: f32[1,8,128], index: 3, kind: output, shape index: {}]  }
   0x1   :  { %9 = vsyncpa [#allocation4], 0  ;;  %s129_s12 = smov [#allocation2]  }
   0x2   :  { %s18_s13 = sshll.u32 %s129_s12, 4  ;;  %s19_s13 = int_to_ptr.vmem [resolvable:$true] %s18_s13 }
   0x3   :  { %s93_s14 = scalar_lea.vmem %s19_s13, 128  ;;  %p98_p1 = scmp.lt.s32.totalorder %s19_s13, %s19_s13 }
   0x4   :  { %p94_p0 = scmp.ne.s32.totalorder %s19_s13, %s93_s14  ;;  %p99_p2 = scmp.lt.s32.totalorder %s93_s14, %s93_s14 }
   0x6   :  { %p100_p3 = por %p99_p2, %p98_p1 }
   0x8   :  { %p101_p4 = pnand %p100_p3, %p94_p0 }
   0xa   :  { %104 = shalt.err (!%p101_p4)
}
   0xb   :  { %21 = dma.hbm_to_vmem [thread:$0]  %s164_s1, 128, %s19_s13, [#allocation3]  }
   0xc   :  { %125 = dma.done.wait [#allocation3], 128  }
   0xd   :  { %126 = vsyncadd [#allocation3], 4294967168  ;;  %v27_v0 = vld [vmem:[%s163_s0] sm:$0xff]  ;;  %vm33_vm0 = vcmask 261120   ;;  %vm51_vm3 = vcmask 7168   ;;  %s130_s0 = smov [#allocation5]  }
   0xe   :  { %v28_v1 = vld [vmem:[#allocation2] sm:$0xff] }
   0xf   :  { %v30_v2 = vsub.f32 %v27_v0, %v28_v1  ;;  %v29_v11 = vld [vmem:[%s165_s2] sm:$0xff]  ;;  %s70_s2 = sshll.u32 %s130_s0, 4  ;;  %s71_s2 = int_to_ptr.vmem [resolvable:$true] %s70_s2 }
  0x10   :  { %v46_v15 = vsub.f32 1.0, %v29_v11  ;;  %s105_s21 = scalar_lea.vmem %s71_s2, 128  ;;  %p110_p6 = scmp.lt.s32.totalorder %s71_s2, %s71_s2 }
  0x11   :  { %v31_v3 = vadd.f32 1e-06, %v30_v2  ;;  %p106_p5 = scmp.ne.s32.totalorder %s71_s2, %s105_s21  ;;  %p111_p7 = scmp.lt.s32.totalorder %s105_s21, %s105_s21 }
  0x13   :  { %v32_v4 = vmul.f32 %v31_v3, %v31_v3  ;;  %p112_p8 = por %p111_p7, %p110_p6 }
  0x15   :  { %v34_v5 = vsel %vm33_vm0, %v32_v4, 0.0  ;;  %p113_p9 = pnand %p112_p8, %p106_p5 }
  0x16   :  { %35 = vadd.xlane.f32.xlu0 %v34_v5 }
  0x9f   :  { %v36_v6 = vpop.xlane.xlu0 %35 }
  0xa0   :  { %83 = vrsqrt.f32 %v36_v6  ;;  %vm39_vm1 = vcmp.eq.f32.partialorder %v36_v6, inf  ;;  %v42_v9 = vand.u32 2147483648, %v36_v6  ;;  %vm41_vm2 = vcmp.eq.f32.partialorder %v36_v6, 0.0 }
  0xa1   :  { %v47_v17 = vmul.f32 %v46_v15, %v36_v6 }
  0xad   :  { %v84_v7 = vpop.eup %83 }
  0xae   :  { %v38_v8 = vmul.f32 %v84_v7, %v36_v6 }
  0xb0   :  { %v40_v10 = vsel %vm39_vm1, %v36_v6, %v38_v8 }
  0xb1   :  { %v43_v12 = vsel %vm41_vm2, %v42_v9, %v40_v10 }
  0xb2   :  { %v44_v13 = vsub.f32 2.0, %v43_v12 }
  0xb4   :  { %v45_v14 = vmax.f32 %v44_v13, 0.0 }
  0xb6   :  { %v48_v16 = vmul.f32 %v45_v14, %v45_v14 }
  0xb8   :  { %v49_v18 = vmul.f32 %v48_v16, %v29_v11 }
  0xba   :  { %v50_v19 = vadd.f32 %v49_v18, %v47_v17 }
  0xbc   :  { %v52_v20 = vsel %vm51_vm3, %v50_v19, 0.0 }
  0xbd   :  { %53 = vadd.xlane.f32.xlu0 %v52_v20 }
 0x146   :  { %v54_v21 = vpop.xlane.xlu0 %53 }
 0x147   :  { %v55_v22 = vrot.slane %v54_v21, 4 }
 0x149   :  { %v56_v23 = vadd.f32 %v55_v22, %v54_v21 }
 0x14b   :  { %v57_v24 = vrot.slane %v56_v23, 2 }
 0x14d   :  { %v58_v25 = vadd.f32 %v57_v24, %v56_v23 }
 0x14f   :  { %v59_v26 = vrot.slane %v58_v25, 1 }
 0x151   :  { %v60_v27 = vadd.f32 %v59_v26, %v58_v25 }
 0x153   :  { %79 = vpush %v60_v27 }
 0x184   :  { %s80_s20 = spop %79 }
 0x185   :  { %v62_v28 = vstv %s80_s20 }
 0x186   :  { %63 = vst [vmem:[#allocation5] sm:$0xff] %v62_v28 }
 0x187   :  { %116 = shalt.err (!%p113_p9)
}
 0x188   :  { %73 = dma.vmem_to_hbm [thread:$0]  %s71_s2, 128, %s166_s3, [#allocation4]  }
 0x189   :  { %127 = dma.done.wait [#allocation4], 128  }
 0x18a   :  { %128 = vsyncadd [#allocation4], 4294967168 }
 0x18b   :  { %77 = vsyncpa [#allocation3], 1 }
 0x18c   :  { %78 = vsyncpa [#allocation4], 1 }

</bundles_post_ra>
